<compile_context>
chip_gen: v5e
topology: v5e:2x2
jax: 0.10.0
libtpu: 0.0.40
codegen_flags: <defaults>
</compile_context>

<pallas_src>
import functools

import jax
import jax.numpy as jnp
import numpy as np
from jax.experimental import pallas as pl
from jax.experimental.pallas import tpu as pltpu


def _mlp_kernel_factory(actor: bool, mxu_bf16: bool):
    def mlp_kernel(x_ref, w1_ref, b1_ref, w2_ref, b2_ref, w3_ref, b3_ref, o_ref):
        x = x_ref[...]
        w1 = w1_ref[...]
        w2 = w2_ref[...]
        w3 = w3_ref[...]
        if mxu_bf16:
            x = x.astype(jnp.bfloat16)
            w1 = w1.astype(jnp.bfloat16)
            w2 = w2.astype(jnp.bfloat16)
            w3 = w3.astype(jnp.bfloat16)

        # fc1 + relu (accumulate f32 on the MXU; bias/ReLU in f32 on the VPU)
        h1 = jnp.dot(x, w1, preferred_element_type=jnp.float32)
        h1 = jnp.maximum(h1 + b1_ref[...], 0.0)
        if mxu_bf16:
            h1 = h1.astype(jnp.bfloat16)

        # fc2 + relu
        h2 = jnp.dot(h1, w2, preferred_element_type=jnp.float32)
        h2 = jnp.maximum(h2 + b2_ref[...], 0.0)
        if mxu_bf16:
            h2 = h2.astype(jnp.bfloat16)

        # fc3 (+ tanh if actor)
        logits = jnp.dot(h2, w3, preferred_element_type=jnp.float32) + b3_ref[...]
        if actor:
            logits = jnp.tanh(logits)
        o_ref[...] = logits.astype(o_ref.dtype)

    return mlp_kernel


def network_forward(x, params, actor: bool = False, mxu_bf16: bool = False,
                    tile_m: int = 512):
    """Pallas forward pass for Network(layer_sizes=[24,128,128,2]).

    Batch is tiled with a 1-D grid (tile size TM, multiple of 8). Weights/biases stay
    resident in VMEM across grid steps. TM in 512-2048 amortizes the ~0.35us/step grid
    overhead while keeping per-step intermediates ((TM,128) f32) far below VMEM limits.
    """
    w1, b1, w2, b2, w3, b3 = params
    B, in_dim = x.shape
    d1 = w1.shape[1]
    d2 = w2.shape[1]
    out_dim = w3.shape[1]

    # Pick the batch tile: whole (8-padded) batch for small B, else tile_m.
    if B <= tile_m:
        tm = max(8, -(-B // 8) * 8)
    else:
        tm = tile_m
    b_pad = -(-B // tm) * tm
    if b_pad != B:
        x = jnp.pad(x, ((0, b_pad - B), (0, 0)))
    n_tiles = b_pad // tm

    # Advisory cost estimate for XLA scheduling.
    param_bytes = sum(int(np.prod(p.shape)) * 4 for p in params)
    cost = pl.CostEstimate(
        flops=2 * b_pad * (in_dim * d1 + d1 * d2 + d2 * out_dim),
        transcendentals=(b_pad * out_dim) if actor else 0,
        bytes_accessed=b_pad * in_dim * 4 + param_bytes + b_pad * out_dim * 4,
    )

    def resident(shape):
        # Constant index_map: DMA'd once, stays in VMEM across all batch tiles.
        return pl.BlockSpec(shape, lambda i: (0, 0))

    kernel = _mlp_kernel_factory(actor, mxu_bf16)
    out = pl.pallas_call(
        kernel,
        out_shape=jax.ShapeDtypeStruct((b_pad, out_dim), jnp.float32),
        grid_spec=pltpu.PrefetchScalarGridSpec(
            num_scalar_prefetch=0,
            grid=(n_tiles,),
            in_specs=[
                pl.BlockSpec((tm, in_dim), lambda i: (i, 0)),
                resident(w1.shape), resident(b1.shape),
                resident(w2.shape), resident(b2.shape),
                resident(w3.shape), resident(b3.shape),
            ],
            out_specs=pl.BlockSpec((tm, out_dim), lambda i: (i, 0)),
        ),
        compiler_params=pltpu.CompilerParams(
            # Batch tiles are independent -> shard across v7x's two TensorCores.
            dimension_semantics=("parallel",),
        ),
        cost_estimate=cost,
    )(x, w1, b1, w2, b2, w3, b3)

    return out[:B] if b_pad != B else out


def init_params(key, layer_sizes=(24, 128, 128, 2)):
    """Deterministic init mirroring Network.reset_parameters().

    PyTorch weight shape is (out, in); hidden_init uses fan_in = weight.size()[0] = out.
    We build (out, in) weights with the same uniform limits, then transpose to (in, out)
    for the kernel. reset_parameters() only touches weights, so biases keep PyTorch's
    default Linear bias init: U(-1/sqrt(in_features), 1/sqrt(in_features)).
    """
    d0, d1, d2, d3 = layer_sizes
    ks = jax.random.split(key, 6)

    def uni(k, shape, lim):
        return jax.random.uniform(k, shape, jnp.float32, minval=-lim, maxval=lim)

    # fc1: weight (d1, d0), lim = 1/sqrt(d1)   (hidden_init uses size()[0] == out dim)
    w1 = uni(ks[0], (d1, d0), 1.0 / np.sqrt(d1)).T          # -> (d0, d1)
    b1 = uni(ks[1], (1, d1), 1.0 / np.sqrt(d0))
    # fc2: weight (d2, d1), lim = 1/sqrt(d2)
    w2 = uni(ks[2], (d2, d1), 1.0 / np.sqrt(d2)).T           # -> (d1, d2)
    b2 = uni(ks[3], (1, d2), 1.0 / np.sqrt(d1))
    # fc3: lim = 0.003 (weights only; bias keeps default Linear init)
    w3 = uni(ks[4], (d3, d2), 0.003).T                       # -> (d2, d3)
    b3 = uni(ks[5], (1, d3), 1.0 / np.sqrt(d2))
    return (w1, b1, w2, b2, w3, b3)


def reference_forward(x, params, actor=False):
    w1, b1, w2, b2, w3, b3 = params
    h1 = jnp.maximum(x @ w1 + b1, 0.0)
    h2 = jnp.maximum(h1 @ w2 + b2, 0.0)
    logits = h2 @ w3 + b3
    return jnp.tanh(logits) if actor else logits


if __name__ == "__main__":
    key = jax.random.PRNGKey(0)
    pkey, xkey, xkey2 = jax.random.split(key, 3)

    layer_sizes = (24, 128, 128, 2)
    params = init_params(pkey, layer_sizes)

    # --- small batch (single-env inference style) ---
    # TODO(synk): the logger/add_histogram side path of Network.forward has no Pallas
    # equivalent and is skipped (it is a no-op when logger is None anyway).
    x_small = jax.random.normal(xkey, (8, layer_sizes[0]), jnp.float32)
    out_c = jax.block_until_ready(network_forward(x_small, params, actor=False))
    out_a = jax.block_until_ready(network_forward(x_small, params, actor=True))
    np.testing.assert_allclose(np.asarray(out_c),
                               np.asarray(reference_forward(x_small, params, False)),
                               rtol=1e-5, atol=1e-5)
    np.testing.assert_allclose(np.asarray(out_a),
                               np.asarray(reference_forward(x_small, params, True)),
                               rtol=1e-5, atol=1e-5)

    # --- larger, non-multiple-of-tile batch: exercises the batch grid + padding ---
    x_big = jax.random.normal(xkey2, (1040, layer_sizes[0]), jnp.float32)
    out_big = jax.block_until_ready(
        network_forward(x_big, params, actor=False, tile_m=512))
    np.testing.assert_allclose(np.asarray(out_big),
                               np.asarray(reference_forward(x_big, params, False)),
                               rtol=1e-5, atol=1e-5)

    # --- bf16 MXU path (native on v6e/v7x), f32 accumulation -> relaxed tolerance ---
    out_bf16 = jax.block_until_ready(
        network_forward(x_big, params, actor=True, mxu_bf16=True, tile_m=512))
    np.testing.assert_allclose(np.asarray(out_bf16),
                               np.asarray(reference_forward(x_big, params, True)),
                               rtol=2e-2, atol=2e-2)

    print("KERNEL_OK")
</pallas_src>

<mosaic_0001>
module attributes {stable_mosaic.version = 11 : i64} {
  func.func @mlp_kernel(%arg0: i32, %arg1: memref<8x24xf32, #tpu.memory_space<vmem>>, %arg2: memref<24x128xf32, #tpu.memory_space<vmem>>, %arg3: memref<1x128xf32, #tpu.memory_space<vmem>>, %arg4: memref<128x128xf32, #tpu.memory_space<vmem>>, %arg5: memref<1x128xf32, #tpu.memory_space<vmem>>, %arg6: memref<128x2xf32, #tpu.memory_space<vmem>>, %arg7: memref<1x2xf32, #tpu.memory_space<vmem>>, %arg8: memref<8x2xf32, #tpu.memory_space<vmem>>) attributes {dimension_semantics = [#tpu.dimension_semantics<parallel>], iteration_bounds = array<i64: 1>, scalar_prefetch = 0 : i64, scratch_operands = 0 : i64, tpu.core_type = #tpu.core_type<tc>, window_params = [{transform_indices = @transform_0, window_bounds = array<i64: 8, 24>}, {pipeline_mode = #tpu.pipeline_mode<synchronous>, transform_indices = @transform_1, window_bounds = array<i64: 24, 128>}, {pipeline_mode = #tpu.pipeline_mode<synchronous>, transform_indices = @transform_2, window_bounds = array<i64: 1, 128>}, {pipeline_mode = #tpu.pipeline_mode<synchronous>, transform_indices = @transform_3, window_bounds = array<i64: 128, 128>}, {pipeline_mode = #tpu.pipeline_mode<synchronous>, transform_indices = @transform_4, window_bounds = array<i64: 1, 128>}, {pipeline_mode = #tpu.pipeline_mode<synchronous>, transform_indices = @transform_5, window_bounds = array<i64: 128, 2>}, {pipeline_mode = #tpu.pipeline_mode<synchronous>, transform_indices = @transform_6, window_bounds = array<i64: 1, 2>}, {transform_indices = @transform_7, window_bounds = array<i64: 8, 2>}]} {
    %c0 = arith.constant 0 : index
    %c0_0 = arith.constant 0 : index
    %0 = vector.load %arg1[%c0, %c0_0] : memref<8x24xf32, #tpu.memory_space<vmem>>, vector<8x24xf32>
    %c0_1 = arith.constant 0 : index
    %c0_2 = arith.constant 0 : index
    %1 = vector.load %arg2[%c0_1, %c0_2] : memref<24x128xf32, #tpu.memory_space<vmem>>, vector<24x128xf32>
    %c0_3 = arith.constant 0 : index
    %c0_4 = arith.constant 0 : index
    %2 = vector.load %arg4[%c0_3, %c0_4] : memref<128x128xf32, #tpu.memory_space<vmem>>, vector<128x128xf32>
    %c0_5 = arith.constant 0 : index
    %c0_6 = arith.constant 0 : index
    %3 = vector.load %arg6[%c0_5, %c0_6] : memref<128x2xf32, #tpu.memory_space<vmem>>, vector<128x2xf32>
    %cst = arith.constant dense<0.000000e+00> : vector<8x128xf32>
    %4 = tpu.matmul %0, %1, %cst {dimension_numbers = #tpu.dot_dimension_numbers<[1], [0], [0], [1], [0, 0, 1, 1], [], []>} : vector<8x24xf32>, vector<24x128xf32>, vector<8x128xf32> -> vector<8x128xf32>
    %c0_7 = arith.constant 0 : index
    %c0_8 = arith.constant 0 : index
    %5 = vector.load %arg3[%c0_7, %c0_8] : memref<1x128xf32, #tpu.memory_space<vmem>>, vector<1x128xf32>
    %6 = vector.broadcast %5 : vector<1x128xf32> to vector<8x128xf32>
    %7 = arith.addf %4, %6 : vector<8x128xf32>
    %cst_9 = arith.constant 0.000000e+00 : f32
    %8 = vector.broadcast %cst_9 : f32 to vector<8x128xf32>
    %9 = arith.maximumf %7, %8 : vector<8x128xf32>
    %cst_10 = arith.constant dense<0.000000e+00> : vector<8x128xf32>
    %10 = tpu.matmul %9, %2, %cst_10 {dimension_numbers = #tpu.dot_dimension_numbers<[1], [0], [0], [1], [0, 0, 1, 1], [], []>} : vector<8x128xf32>, vector<128x128xf32>, vector<8x128xf32> -> vector<8x128xf32>
    %c0_11 = arith.constant 0 : index
    %c0_12 = arith.constant 0 : index
    %11 = vector.load %arg5[%c0_11, %c0_12] : memref<1x128xf32, #tpu.memory_space<vmem>>, vector<1x128xf32>
    %12 = vector.broadcast %11 : vector<1x128xf32> to vector<8x128xf32>
    %13 = arith.addf %10, %12 : vector<8x128xf32>
    %cst_13 = arith.constant 0.000000e+00 : f32
    %14 = vector.broadcast %cst_13 : f32 to vector<8x128xf32>
    %15 = arith.maximumf %13, %14 : vector<8x128xf32>
    %cst_14 = arith.constant dense<0.000000e+00> : vector<8x2xf32>
    %16 = tpu.matmul %15, %3, %cst_14 {dimension_numbers = #tpu.dot_dimension_numbers<[1], [0], [0], [1], [0, 0, 1, 1], [], []>} : vector<8x128xf32>, vector<128x2xf32>, vector<8x2xf32> -> vector<8x2xf32>
    %c0_15 = arith.constant 0 : index
    %c0_16 = arith.constant 0 : index
    %17 = vector.load %arg7[%c0_15, %c0_16] : memref<1x2xf32, #tpu.memory_space<vmem>>, vector<1x2xf32>
    %18 = vector.broadcast %17 : vector<1x2xf32> to vector<8x2xf32>
    %19 = arith.addf %16, %18 : vector<8x2xf32>
    %c0_17 = arith.constant 0 : index
    %c0_18 = arith.constant 0 : index
    %20 = vector.load %arg8[%c0_17, %c0_18] : memref<8x2xf32, #tpu.memory_space<vmem>>, vector<8x2xf32>
    tpu.vector_store %arg8[%c0_17, %c0_18], %19 {strides = array<i32>} : memref<8x2xf32, #tpu.memory_space<vmem>>, vector<8x2xf32>,
    return
  }
  func.func @transform_0(%arg0: i32) -> (i32, i32) {
    %c0_i32 = arith.constant 0 : i32
    %c0_i32_0 = arith.constant 0 : i32
    return %arg0, %c0_i32 : i32, i32
  }
  func.func @transform_1(%arg0: i32) -> (i32, i32) {
    %c0_i32 = arith.constant 0 : i32
    %c0_i32_0 = arith.constant 0 : i32
    %c0_i32_1 = arith.constant 0 : i32
    return %c0_i32, %c0_i32_0 : i32, i32
  }
  func.func @transform_2(%arg0: i32) -> (i32, i32) {
    %c0_i32 = arith.constant 0 : i32
    %c0_i32_0 = arith.constant 0 : i32
    %c0_i32_1 = arith.constant 0 : i32
    return %c0_i32, %c0_i32_0 : i32, i32
  }
  func.func @transform_3(%arg0: i32) -> (i32, i32) {
    %c0_i32 = arith.constant 0 : i32
    %c0_i32_0 = arith.constant 0 : i32
    %c0_i32_1 = arith.constant 0 : i32
    return %c0_i32, %c0_i32_0 : i32, i32
  }
  func.func @transform_4(%arg0: i32) -> (i32, i32) {
    %c0_i32 = arith.constant 0 : i32
    %c0_i32_0 = arith.constant 0 : i32
    %c0_i32_1 = arith.constant 0 : i32
    return %c0_i32, %c0_i32_0 : i32, i32
  }
  func.func @transform_5(%arg0: i32) -> (i32, i32) {
    %c0_i32 = arith.constant 0 : i32
    %c0_i32_0 = arith.constant 0 : i32
    %c0_i32_1 = arith.constant 0 : i32
    return %c0_i32, %c0_i32_0 : i32, i32
  }
  func.func @transform_6(%arg0: i32) -> (i32, i32) {
    %c0_i32 = arith.constant 0 : i32
    %c0_i32_0 = arith.constant 0 : i32
    %c0_i32_1 = arith.constant 0 : i32
    return %c0_i32, %c0_i32_0 : i32, i32
  }
  func.func @transform_7(%arg0: i32) -> (i32, i32) {
    %c0_i32 = arith.constant 0 : i32
    %c0_i32_0 = arith.constant 0 : i32
    return %arg0, %c0_i32 : i32, i32
  }
}

</mosaic_0001>

<bundles_post_ra>
// kernel: tpu_custom_call.1
= control target key start
LH: loop header
LB: loop body
LE: loop exit
PB: predicated region body
PF: predicated region fallthrough
CT: control target
= control target key end

     0   :  { %12 = vsyncpa [#allocation3], 0  ;;  %s396_s0 = inlined_call_operand.hbm [shape: f32[8,24], index: 0, kind: input, shape index: {}]   ;;  %s397_s1 = inlined_call_operand.hbm [shape: f32[24,128], index: 1, kind: input, shape index: {}]   ;;  %s398_s2 = inlined_call_operand.vmem [shape: f32[1,128], index: 2, kind: input, shape index: {}]   ;;  %s399_s3 = inlined_call_operand.vmem [shape: f32[128,128], index: 3, kind: input, shape index: {}]   ;;  %s400_s4 = inlined_call_operand.vmem [shape: f32[1,128], index: 4, kind: input, shape index: {}]   ;;  %s401_s5 = inlined_call_operand.vmem [shape: f32[128,2], index: 5, kind: input, shape index: {}]   ;;  %s402_s6 = inlined_call_operand.vmem [shape: f32[1,2], index: 6, kind: input, shape index: {}]   ;;  %s403_s7 = inlined_call_operand.vmem [shape: f32[8,2], index: 7, kind: output, shape index: {}]  }
   0x1   :  { %s19_s26 = sshll.u32 %s396_s0, 4  ;;  %s20_s26 = int_to_ptr.hbm [resolvable:$true] %s19_s26 }
   0x2   :  { %13 = vsyncpa [#allocation5], 0  ;;  %s238_s27 = smov [#allocation2]   ;;  %s29_s8 = sshll.u32 %s397_s1, 4  ;;  %s30_s8 = int_to_ptr.hbm [resolvable:$true] %s29_s8 }
   0x3   :  { %s21_s28 = sshll.u32 %s238_s27, 4  ;;  %s239_s9 = smov [#allocation4]   ;;  %s22_s28 = int_to_ptr.vmem [resolvable:$true] %s21_s28 }
   0x4   :  { %24 = dma.hbm_to_vmem [thread:$0]  %s20_s26, 128, %s22_s28, [#allocation3]  }
   0x5   :  { %s31_s10 = sshll.u32 %s239_s9, 4  ;;  %s240_s11 = smov 128   ;;  %s32_s10 = int_to_ptr.vmem [resolvable:$true] %s31_s10 }
   0x6   :  { %s241_s12 = smov 8  }
   0x7   :  { %37 = dma.hbm_to_vmem [thread:$0]  %s30_s8, 384, %s32_s10, [#allocation5], %s240_s11, %s240_s11, %s241_s12  }
   0x8   :  { %234 = dma.done.wait [#allocation3], 128  }
   0x9   :  { %235 = vsyncadd [#allocation3], 4294967168 }
   0xa   :  { %236 = dma.done.wait [#allocation5], 384  }
   0xb   :  { %237 = vsyncadd [#allocation5], 4294966912  ;;  %v59_v0 = vld [vmem:[#allocation4 + $0x10] sm:$0xff]  ;;  %v58_v1 = vld [vmem:[#allocation4 + $0x8] sm:$0xff]  ;;  %vm96_vm0 = vcmask 195584   ;;  %vm170_vm1 = vcmask 15360  }
   0xc   :  { %113 = vmatpush.msra.mxu0 %v59_v0  ;;  %v75_v2 = vld [vmem:[%s399_s3 + $0x78] sm:$0xff]  ;;  %v74_v3 = vld [vmem:[%s399_s3 + $0x70] sm:$0xff]  ;;  %v57_v4 = vld [vmem:[#allocation4] sm:$0xff] }
   0xd   :  { %125 = vmatpush.msra.mxu1 %v75_v2  ;;  %v56_v5 = vld [vmem:[#allocation2] sm:$0xff]  ;;  %v73_v6 = vld [vmem:[%s399_s3 + $0x68] sm:$0xff]  ;;  %v71_v8 = vld [vmem:[%s399_s3 + $0x58] sm:$0xff] }
   0xe   :  { %114 = vmatpush.msra.mxu0 %v58_v1  ;;  %v72_v7 = vld [vmem:[%s399_s3 + $0x60] sm:$0xff]  ;;  %v70_v9 = vld [vmem:[%s399_s3 + $0x50] sm:$0xff]  ;;  %v69_v10 = vld [vmem:[%s399_s3 + $0x48] sm:$0xff] }
   0xf   :  { %126 = vmatpush.msra.mxu1 %v74_v3  ;;  %v68_v11 = vld [vmem:[%s399_s3 + $0x40] sm:$0xff]  ;;  %v67_v12 = vld [vmem:[%s399_s3 + $0x38] sm:$0xff]  ;;  %v66_v13 = vld [vmem:[%s399_s3 + $0x30] sm:$0xff] }
  0x10   :  { %115 = vmatpush.msra.mxu0 %v57_v4  ;;  %v65_v14 = vld [vmem:[%s399_s3 + $0x28] sm:$0xff]  ;;  %v64_v15 = vld [vmem:[%s399_s3 + $0x20] sm:$0xff]  ;;  %v63_v16 = vld [vmem:[%s399_s3 + $0x18] sm:$0xff] }
  0x11   :  { %178 = vmatmul.msk.f32.vlgmr.msra.gmra.mxu0 %vm96_vm0, %v56_v5  ;;  %127 = vmatpush.msra.mxu1 %v73_v6  ;;  %v62_v17 = vld [vmem:[%s399_s3 + $0x10] sm:$0xff]  ;;  %v61_v18 = vld [vmem:[%s399_s3 + $0x8] sm:$0xff]  ;;  %v60_v19 = vld [vmem:[%s399_s3] sm:$0xff] }
  0x12   :  { %v91_v20 = vld [vmem:[%s401_s5 + $0x78] sm:$0xff]  ;;  %v90_v21 = vld [vmem:[%s401_s5 + $0x70] sm:$0xff]  ;;  %v89_v22 = vld [vmem:[%s401_s5 + $0x68] sm:$0xff] }
  0x13   :  { %128 = vmatpush.msra.mxu1 %v72_v7  ;;  %150 = vmatpush.msra.mxu2 %v91_v20  ;;  %v88_v23 = vld [vmem:[%s401_s5 + $0x60] sm:$0xff]  ;;  %v87_v24 = vld [vmem:[%s401_s5 + $0x58] sm:$0xff]  ;;  %v86_v25 = vld [vmem:[%s401_s5 + $0x50] sm:$0xff] }
  0x14   :  { %v85_v26 = vld [vmem:[%s401_s5 + $0x48] sm:$0xff]  ;;  %v84_v27 = vld [vmem:[%s401_s5 + $0x40] sm:$0xff]  ;;  %v83_v28 = vld [vmem:[%s401_s5 + $0x38] sm:$0xff] }
  0x15   :  { %129 = vmatpush.msra.mxu1 %v71_v8  ;;  %151 = vmatpush.msra.mxu2 %v90_v21  ;;  %v82_v29 = vld [vmem:[%s401_s5 + $0x30] sm:$0xff]  ;;  %v81_v30 = vld [vmem:[%s401_s5 + $0x28] sm:$0xff]  ;;  %v80_v31 = vld [vmem:[%s401_s5 + $0x20] sm:$0xff] }
  0x16   :  { %v79_v32 = vld [vmem:[%s401_s5 + $0x18] sm:$0xff]  ;;  %v183_v33 = vld [vmem:[%s398_s2] ss:$0 sm:$0xff]  ;;  %v78_v37 = vld [vmem:[%s401_s5 + $0x10] sm:$0xff] }
  0x17   :  { %130 = vmatpush.msra.mxu1 %v70_v9  ;;  %152 = vmatpush.msra.mxu2 %v89_v22  ;;  %v77_v38 = vld [vmem:[%s401_s5 + $0x8] sm:$0xff]  ;;  %v76_v39 = vld [vmem:[%s401_s5] sm:$0xff] }
  0x18   :  { %v184_v40 = vld [vmem:[%s400_s4] ss:$0 sm:$0xff] }
  0x19   :  { %131 = vmatpush.msra.mxu1 %v69_v10  ;;  %153 = vmatpush.msra.mxu2 %v88_v23  ;;  %v185_v44 = vld [vmem:[%s402_s6] ss:$0 sm:$0xff] }
  0x1b   :  { %132 = vmatpush.msra.mxu1 %v68_v11  ;;  %154 = vmatpush.msra.mxu2 %v87_v24 }
  0x1d   :  { %133 = vmatpush.msra.mxu1 %v67_v12  ;;  %155 = vmatpush.msra.mxu2 %v86_v25 }
  0x1f   :  { %134 = vmatpush.msra.mxu1 %v66_v13  ;;  %156 = vmatpush.msra.mxu2 %v85_v26 }
  0x21   :  { %135 = vmatpush.msra.mxu1 %v65_v14  ;;  %157 = vmatpush.msra.mxu2 %v84_v27 }
  0x23   :  { %136 = vmatpush.msra.mxu1 %v64_v15  ;;  %158 = vmatpush.msra.mxu2 %v83_v28 }
  0x25   :  { %137 = vmatpush.msra.mxu1 %v63_v16  ;;  %159 = vmatpush.msra.mxu2 %v82_v29 }
  0x27   :  { %138 = vmatpush.msra.mxu1 %v62_v17  ;;  %160 = vmatpush.msra.mxu2 %v81_v30 }
  0x29   :  { %139 = vmatpush.msra.mxu1 %v61_v18  ;;  %161 = vmatpush.msra.mxu2 %v80_v31 }
  0x2b   :  { %140 = vmatpush.msra.mxu1 %v60_v19  ;;  %162 = vmatpush.msra.mxu2 %v79_v32 }
  0x2d   :  { %163 = vmatpush.msra.mxu2 %v78_v37 }
  0x2f   :  { %164 = vmatpush.msra.mxu2 %v77_v38 }
  0x31   :  { %165 = vmatpush.msra.mxu2 %v76_v39 }
  0x8e   :  { %v117_v34 = vpop.f32.mrf.mxu0 }
  0x8f   :  { %v118_v35 = vadd.f32 %v183_v33, %v117_v34 }
  0x91   :  { %v120_v36 = vmax.f32 %v118_v35, 0.0 }
  0x93   :  { %141 = vmatmul.f32.vlgmr.msra.gmra.mxu1 %v120_v36 }
 0x110   :  { %v142_v41 = vpop.f32.mrf.mxu1 }
 0x111   :  { %v143_v42 = vadd.f32 %v184_v40, %v142_v41 }
 0x113   :  { %v145_v43 = vmax.f32 %v143_v42, 0.0 }
 0x115   :  { %166 = vmatmul.f32.vlgmr.msra.gmra.mxu2 %v145_v43 }
 0x198   :  { %v167_v45 = vpop.f32.mrf.mxu2 }
 0x199   :  { %v168_v46 = vadd.f32 %v185_v44, %v167_v45 }
 0x19b   :  { %171 = vst.msk [vmem:[%s403_s7] sm:$0xff] %vm170_vm1, %v168_v46 }
 0x19c   :  { %176 = vsyncpa [#allocation3], 1 }
 0x19d   :  { %177 = vsyncpa [#allocation5], 1 }

</bundles_post_ra>
